<compile_context>
chip_gen: v6e
topology: v6e:2x2x1
jax: 0.10.0
libtpu: 0.0.40
codegen_flags: <defaults>
</compile_context>

<pallas_src>
import functools

import jax
import jax.numpy as jnp
from jax.experimental import pallas as pl
from jax.experimental.pallas import tpu as pltpu

_LANE = 128
_SUBLANE = 8


def _round_up(n, m):
    return ((n + m - 1) // m) * m


def _cdiv(a, b):
    return (a + b - 1) // b


def _vmem_budget_bytes():
    """Per-generation VMEM budget with headroom for compiler scratch."""
    cap = 64 * 1024 * 1024  # conservative default: v7x physical VMEM
    try:
        cap_q = int(getattr(pltpu.get_tpu_info(), "vmem_capacity_bytes", 0))
        if cap_q > 0:
            cap = cap_q
    except Exception:
        pass
    # ~48 MiB on v7x (64 MiB physical), ~96 MiB on v5e/v6e (128 MiB physical).
    return min((cap // 4) * 3, 100 * 1024 * 1024)


def _pick_tiles(batch, feat, vmem_budget):
    """Choose (TB, TD) batch/feature tile sizes that fit the VMEM budget."""
    d_lanes = _round_up(max(feat, 1), _LANE)  # lane padding when D < 128
    # Reserve: weight double-buffer + slack for Mosaic internal scratch.
    usable = vmem_budget - 4 * 1024 * 1024 - 2 * _SUBLANE * d_lanes * 4
    usable = max(usable, 8 * 1024 * 1024)
    # Per batch-row VMEM cost: double-buffered x row + five (1, TB) f32 slabs
    # (2 outputs x 2 buffers + 1 accumulator), each sublane-padded to 8.
    out_cost = 5 * _SUBLANE * 4
    tb_full_d = ((usable // (2 * 4 * d_lanes + out_cost)) // _LANE) * _LANE

    if tb_full_d >= _LANE:
        tb, td = tb_full_d, feat                 # full D per step
    else:
        # Feature dim too large for a full-D tile under the budget: tile D too.
        tb = 4 * _LANE
        td = (((usable - out_cost * tb) // (2 * 4 * tb)) // _LANE) * _LANE
        td = max(td, _LANE)

    # Don't tile past the batch; prefer >= 2 batch tiles (feeds both v7x TCs)
    # as long as every tile keeps a full lane-width.
    tb = min(tb, _round_up(max(batch, 1), _LANE))
    if batch >= 2 * _LANE:
        tb = min(tb, _round_up(_cdiv(batch, 2), _LANE))
    tb = max(tb, _LANE)
    return tb, td


def _logreg_kernel(x_ref, w_ref, b_ref, logit_ref, prob_ref, acc_ref,
                   *, d_total, block_d, mask_d):
    # x_ref:  (TB, TD) f32 VMEM tile of the batch (streamed / pipelined)
    # w_ref:  (1, TD)  f32 VMEM slice of the weight row (resident in i)
    # b_ref:  (1,)     f32 SMEM scalar
    # logit_ref / prob_ref: (1, TB) lane-dense output slabs (written at last k)
    # acc_ref: (1, TB) f32 accumulator across the D reduction axis
    k = pl.program_id(1)

    @pl.when(k == 0)
    def _init():
        acc_ref[...] = jnp.zeros_like(acc_ref)

    x = x_ref[...]
    w_row = w_ref[...]
    if mask_d:
        # Last D block may be partial: padding of partial input blocks is
        # unspecified data, so zero both operands beyond column d_total.
        col = jax.lax.broadcasted_iota(jnp.int32, w_row.shape, 1)
        valid = (k * block_d + col) < d_total
        w_row = jnp.where(valid, w_row, 0.0)
        x = jnp.where(valid, x, 0.0)

    # Contract over D with the batch landing on the minor (lane) axis of the
    # result: (1, TD) . (TB, TD)^T -> (1, TB)  => lane-dense, unmasked stores.
    # TODO(synk): use an explicit highest-precision dot if strict f32 parity is
    # required at very large D (throughput is DMA-bound either way).
    acc_ref[...] += jnp.einsum("od,bd->ob", w_row, x,
                               preferred_element_type=jnp.float32)

    @pl.when(k == pl.num_programs(1) - 1)
    def _finalize():
        logits = acc_ref[...] + b_ref[0]
        logit_ref[...] = logits.astype(logit_ref.dtype)
        prob_ref[...] = jax.nn.sigmoid(logits).astype(prob_ref.dtype)


@jax.jit
def logistic_regression(x, w, b):
    """x: (B, D), w: (D, 1) or (D,), b: (1,) -> (logits (B, 1), probs (B, 1))."""
    B, D = x.shape
    w_row = w.reshape(1, D).astype(x.dtype)
    b_vec = b.reshape(1).astype(jnp.float32)

    vmem_budget = _vmem_budget_bytes()
    TB, TD = _pick_tiles(B, D, vmem_budget)
    num_b_tiles = _cdiv(B, TB)       # uneven trailing batch block is fine
    num_d_tiles = _cdiv(D, TD)
    out_width = num_b_tiles * TB
    mask_d = (D % TD) != 0

    kernel = functools.partial(_logreg_kernel,
                               d_total=D, block_d=TD, mask_d=mask_d)

    out_shapes = (
        jax.ShapeDtypeStruct((1, out_width), x.dtype),  # logits (lane-dense)
        jax.ShapeDtypeStruct((1, out_width), x.dtype),  # probs  (lane-dense)
    )

    cost = pl.CostEstimate(
        flops=2 * B * D + 2 * B,
        transcendentals=B,
        bytes_accessed=B * D * 4 + D * 4 + 4 + 2 * B * 4,
    )

    logits_row, probs_row = pl.pallas_call(
        kernel,
        out_shape=out_shapes,
        grid=(num_b_tiles, num_d_tiles),
        in_specs=[
            pl.BlockSpec((TB, TD), lambda i, k: (i, k)),           # stream x
            pl.BlockSpec((1, TD), lambda i, k: (0, k)),            # weight slice
            pl.BlockSpec(memory_space=pltpu.MemorySpace.SMEM),     # bias scalar
        ],
        out_specs=[
            pl.BlockSpec((1, TB), lambda i, k: (0, i)),
            pl.BlockSpec((1, TB), lambda i, k: (0, i)),
        ],
        scratch_shapes=[pltpu.VMEM((1, TB), jnp.float32)],
        compiler_params=pltpu.CompilerParams(
            dimension_semantics=("parallel", "arbitrary"),
            vmem_limit_bytes=int(vmem_budget),
        ),
        cost_estimate=cost,
    )(x, w_row, b_vec)

    logits = logits_row[0, :B].reshape(B, 1)
    probs = probs_row[0, :B].reshape(B, 1)
    return logits, probs


if __name__ == "__main__":
    key = jax.random.PRNGKey(0)
    k_x, k_w, k_b = jax.random.split(key, 3)

    batch = 8
    input_num_attr = 32  # feature dim of the Linear layer

    # Deterministic parameter init (mimic nn.Linear default U(-1/sqrt(fan_in), +)).
    bound = 1.0 / jnp.sqrt(jnp.float32(input_num_attr))
    w = jax.random.uniform(k_w, (input_num_attr, 1), jnp.float32, -bound, bound)
    b = jax.random.uniform(k_b, (1,), jnp.float32, -bound, bound)

    x = jax.random.normal(k_x, (batch, input_num_attr), jnp.float32)

    logits, probs = logistic_regression(x, w, b)
    jax.block_until_ready((logits, probs))

    # Reference check in plain JAX.
    ref_logits = x @ w + b
    ref_probs = jax.nn.sigmoid(ref_logits)
    assert jnp.allclose(logits, ref_logits, atol=1e-5, rtol=1e-5)
    assert jnp.allclose(probs, ref_probs, atol=1e-5, rtol=1e-5)

    print("KERNEL_OK")
</pallas_src>

<mosaic_0001>
module attributes {stable_mosaic.version = 11 : i64} {
  func.func @_logreg_kernel(%arg0: i32, %arg1: i32, %arg2: memref<128x32xf32, #tpu.memory_space<vmem>>, %arg3: memref<1x32xf32, #tpu.memory_space<vmem>>, %arg4: memref<1xf32, #tpu.memory_space<smem>>, %arg5: memref<1x128xf32, #tpu.memory_space<vmem>>, %arg6: memref<1x128xf32, #tpu.memory_space<vmem>>, %arg7: memref<1x128xf32, #tpu.memory_space<vmem>>) attributes {dimension_semantics = [#tpu.dimension_semantics<parallel>, #tpu.dimension_semantics<arbitrary>], iteration_bounds = array<i64: 1, 1>, scalar_prefetch = 0 : i64, scratch_operands = 1 : i64, tpu.core_type = #tpu.core_type<tc>, window_params = [{transform_indices = @transform_0, window_bounds = array<i64: 128, 32>}, {transform_indices = @transform_1, window_bounds = array<i64: 1, 32>}, {transform_indices = @transform_2, window_bounds = array<i64: 1>}, {transform_indices = @transform_3, window_bounds = array<i64: 1, 128>}, {transform_indices = @transform_4, window_bounds = array<i64: 1, 128>}]} {
    %c0_i32 = arith.constant 0 : i32
    %0 = arith.cmpi eq, %arg1, %c0_i32 : i32
    %1 = arith.extui %0 : i1 to i32
    %c0_i32_0 = arith.constant 0 : i32
    %2 = arith.cmpi ne, %1, %c0_i32_0 : i32
    scf.if %2 {
      %cst_10 = arith.constant 0.000000e+00 : f32
      %12 = vector.broadcast %cst_10 : f32 to vector<1x128xf32>
      %c0_11 = arith.constant 0 : index
      %c0_12 = arith.constant 0 : index
      %13 = vector.load %arg7[%c0_11, %c0_12] : memref<1x128xf32, #tpu.memory_space<vmem>>, vector<1x128xf32>
      tpu.vector_store %arg7[%c0_11, %c0_12], %12 {strides = array<i32>} : memref<1x128xf32, #tpu.memory_space<vmem>>, vector<1x128xf32>,
    } else {
    }
    %c0 = arith.constant 0 : index
    %c0_1 = arith.constant 0 : index
    %3 = vector.load %arg2[%c0, %c0_1] : memref<128x32xf32, #tpu.memory_space<vmem>>, vector<128x32xf32>
    %c0_2 = arith.constant 0 : index
    %c0_3 = arith.constant 0 : index
    %4 = vector.load %arg3[%c0_2, %c0_3] : memref<1x32xf32, #tpu.memory_space<vmem>>, vector<1x32xf32>
    %c0_4 = arith.constant 0 : index
    %c0_5 = arith.constant 0 : index
    %5 = vector.load %arg7[%c0_4, %c0_5] : memref<1x128xf32, #tpu.memory_space<vmem>>, vector<1x128xf32>
    "tpu.trace_start"() <{level = 10 : i32, message = "od,bd->ob"}> : () -> ()
    %cst = arith.constant dense<0.000000e+00> : vector<1x128xf32>
    %6 = tpu.matmul %4, %3, %cst {dimension_numbers = #tpu.dot_dimension_numbers<[1], [1], [0], [0], [0, 0, 1, 0], [], []>} : vector<1x32xf32>, vector<128x32xf32>, vector<1x128xf32> -> vector<1x128xf32>
    "tpu.trace_stop"() : () -> ()
    %7 = arith.addf %5, %6 : vector<1x128xf32>
    %c0_6 = arith.constant 0 : index
    %c0_7 = arith.constant 0 : index
    %8 = vector.load %arg7[%c0_6, %c0_7] : memref<1x128xf32, #tpu.memory_space<vmem>>, vector<1x128xf32>
    tpu.vector_store %arg7[%c0_6, %c0_7], %7 {strides = array<i32>} : memref<1x128xf32, #tpu.memory_space<vmem>>, vector<1x128xf32>,
    %c0_i32_8 = arith.constant 0 : i32
    %9 = arith.cmpi eq, %arg1, %c0_i32_8 : i32
    %10 = arith.extui %9 : i1 to i32
    %c0_i32_9 = arith.constant 0 : i32
    %11 = arith.cmpi ne, %10, %c0_i32_9 : i32
    scf.if %11 {
      %c0_10 = arith.constant 0 : index
      %c0_11 = arith.constant 0 : index
      %12 = vector.load %arg7[%c0_10, %c0_11] : memref<1x128xf32, #tpu.memory_space<vmem>>, vector<1x128xf32>
      %c0_12 = arith.constant 0 : index
      %13 = memref.load %arg4[%c0_12] : memref<1xf32, #tpu.memory_space<smem>>
      %14 = vector.broadcast %13 : f32 to vector<1x128xf32>
      %15 = arith.addf %12, %14 : vector<1x128xf32>
      %c0_13 = arith.constant 0 : index
      %c0_14 = arith.constant 0 : index
      %16 = vector.load %arg5[%c0_13, %c0_14] : memref<1x128xf32, #tpu.memory_space<vmem>>, vector<1x128xf32>
      tpu.vector_store %arg5[%c0_13, %c0_14], %15 {strides = array<i32>} : memref<1x128xf32, #tpu.memory_space<vmem>>, vector<1x128xf32>,
      %17 = arith.negf %15 : vector<1x128xf32>
      %18 = math.exp %17 : vector<1x128xf32>
      %cst_15 = arith.constant 1.000000e+00 : f32
      %19 = vector.broadcast %cst_15 : f32 to vector<1x128xf32>
      %20 = arith.addf %19, %18 : vector<1x128xf32>
      %21 = arith.divf %19, %20 : vector<1x128xf32>
      %c0_16 = arith.constant 0 : index
      %c0_17 = arith.constant 0 : index
      %22 = vector.load %arg6[%c0_16, %c0_17] : memref<1x128xf32, #tpu.memory_space<vmem>>, vector<1x128xf32>
      tpu.vector_store %arg6[%c0_16, %c0_17], %21 {strides = array<i32>} : memref<1x128xf32, #tpu.memory_space<vmem>>, vector<1x128xf32>,
    } else {
    }
    return
  }
  func.func @transform_0(%arg0: i32, %arg1: i32) -> (i32, i32) {
    %c0_i32 = arith.constant 0 : i32
    return %arg0, %arg1 : i32, i32
  }
  func.func @transform_1(%arg0: i32, %arg1: i32) -> (i32, i32) {
    %c0_i32 = arith.constant 0 : i32
    %c0_i32_0 = arith.constant 0 : i32
    return %c0_i32, %arg1 : i32, i32
  }
  func.func @transform_2(%arg0: i32, %arg1: i32) -> i32 {
    %c0_i32 = arith.constant 0 : i32
    %c0_i32_0 = arith.constant 0 : i32
    return %c0_i32 : i32
  }
  func.func @transform_3(%arg0: i32, %arg1: i32) -> (i32, i32) {
    %c0_i32 = arith.constant 0 : i32
    %c0_i32_0 = arith.constant 0 : i32
    return %c0_i32, %arg0 : i32, i32
  }
  func.func @transform_4(%arg0: i32, %arg1: i32) -> (i32, i32) {
    %c0_i32 = arith.constant 0 : i32
    %c0_i32_0 = arith.constant 0 : i32
    return %c0_i32, %arg0 : i32, i32
  }
}

</mosaic_0001>

<bundles_post_ra>
// kernel: logistic_regression.1
= control target key start
LH: loop header
LB: loop body
LE: loop exit
PB: predicated region body
PF: predicated region fallthrough
CT: control target
= control target key end

     0   :  { %11 = vsyncpa [#allocation5], 0  ;;  %s365_s0 = inlined_call_operand.hbm [shape: f32[8,32], index: 0, kind: input, shape index: {}]   ;;  %s366_s1 = inlined_call_operand.vmem [shape: f32[1,32], index: 1, kind: input, shape index: {}]   ;;  %s367_s2 = inlined_call_operand.<no memory space> [shape: f32[1], index: 2, kind: input, shape index: {}]   ;;  %s368_s3 = inlined_call_operand.vmem [shape: f32[1,128], index: 3, kind: output, shape index: {0}]   ;;  %s369_s4 = inlined_call_operand.vmem [shape: f32[1,128], index: 4, kind: output, shape index: {1}]  }
   0x1   :  { %16 = vsyncadd [#allocation5], 1920  ;;  %s303_s15 = smov [#allocation4]  }
   0x2   :  { %s17_s16 = sshll.u32 %s303_s15, 4  ;;  %s18_s16 = int_to_ptr.vmem [resolvable:$true] %s17_s16 }
   0x3   :  { %s289_s17 = scalar_lea.vmem %s18_s16, 128  ;;  %s293_s18 = scalar_lea.vmem %s18_s16, 2048 }
   0x4   :  { %p290_p0 = scmp.ne.s32.totalorder %s18_s16, %s289_s17  ;;  %p294_p1 = scmp.lt.s32.totalorder %s18_s16, %s18_s16 }
   0x5   :  { %p295_p2 = scmp.lt.s32.totalorder %s293_s18, %s289_s17 }
   0x7   :  { %p296_p3 = por %p295_p2, %p294_p1 }
   0x9   :  { %p297_p4 = pnand %p296_p3, %p290_p0 }
   0xb   :  { %300 = shalt.err (!%p297_p4)
}
   0xc   :  { %s304_s19 = smov 128   ;;  %s305_s20 = smov 8  }
   0xd   :  { %23 = dma.hbm_to_vmem [thread:$0]  %s365_s0, 128, %s18_s16, [#allocation5], %s304_s19, %s304_s19, %s305_s20  }
   0xe   :  { %301 = dma.done.wait [#allocation5], 2048  }
   0xf   :  { %302 = vsyncadd [#allocation5], 4294965248  ;;  %v306_v0 = vmov 0.0   ;;  %vm307_vm0 = vmmov 0   ;;  %vm54_vm1 = vcmask 261120   ;;  %v51_v1 = vld [vmem:[#allocation4 + $0x78] sm:$0xff]  ;;  %v183_v22 = vstv %s367_s2 }
  0x10   :  { %237 = vmatprep.subr.mxu0 %v306_v0  ;;  %35 = vst [vmem:[#allocation2] sm:$0x1] %v306_v0  ;;  %269 = vmatprep.mubr.msk.f32.mxu0 %vm307_vm0, %v306_v0  ;;  %v50_v2 = vld [vmem:[#allocation4 + $0x70] sm:$0xff]  ;;  %v49_v3 = vld [vmem:[#allocation4 + $0x68] sm:$0xff]  ;;  %v48_v4 = vld [vmem:[#allocation4 + $0x60] sm:$0xff] }
  0x11   :  { %238 = vmatpush3.xpose.msk.msra.mxu0 %vm54_vm1, %v51_v1  ;;  %v47_v5 = vld [vmem:[#allocation4 + $0x58] sm:$0xff]  ;;  %v46_v6 = vld [vmem:[#allocation4 + $0x50] sm:$0xff]  ;;  %v45_v7 = vld [vmem:[#allocation4 + $0x48] sm:$0xff] }
  0x12   :  { %239 = vmatprep.subr.mxu0 %v306_v0  ;;  %v44_v8 = vld [vmem:[#allocation4 + $0x40] sm:$0xff]  ;;  %v43_v9 = vld [vmem:[#allocation4 + $0x38] sm:$0xff]  ;;  %v42_v10 = vld [vmem:[#allocation4 + $0x30] sm:$0xff] }
  0x13   :  { %v41_v11 = vld [vmem:[#allocation4 + $0x28] sm:$0xff]  ;;  %v40_v12 = vld [vmem:[#allocation4 + $0x20] sm:$0xff]  ;;  %v39_v13 = vld [vmem:[#allocation4 + $0x18] sm:$0xff] }
  0x14   :  { %v38_v14 = vld [vmem:[#allocation4 + $0x10] sm:$0xff]  ;;  %v37_v15 = vld [vmem:[#allocation4 + $0x8] sm:$0xff]  ;;  %v36_v16 = vld [vmem:[#allocation4] sm:$0xff] }
  0x15   :  { %240 = vmatpush3.xpose.msk.msra.mxu0 %vm54_vm1, %v50_v2  ;;  %v52_v17 = vld [vmem:[%s366_s1] sm:$0x1] }
  0x16   :  { %241 = vmatprep.subr.mxu0 %v306_v0 }
  0x17   :  { %v53_v18 = vld [vmem:[#allocation2] sm:$0x1] }
  0x19   :  { %242 = vmatpush3.xpose.msk.msra.mxu0 %vm54_vm1, %v49_v3 }
  0x1a   :  { %243 = vmatprep.subr.mxu0 %v306_v0 }
  0x1d   :  { %244 = vmatpush3.xpose.msk.msra.mxu0 %vm54_vm1, %v48_v4 }
  0x1e   :  { %245 = vmatprep.subr.mxu0 %v306_v0 }
  0x21   :  { %246 = vmatpush3.xpose.msk.msra.mxu0 %vm54_vm1, %v47_v5 }
  0x22   :  { %247 = vmatprep.subr.mxu0 %v306_v0 }
  0x25   :  { %248 = vmatpush3.xpose.msk.msra.mxu0 %vm54_vm1, %v46_v6 }
  0x26   :  { %249 = vmatprep.subr.mxu0 %v306_v0 }
  0x29   :  { %250 = vmatpush3.xpose.msk.msra.mxu0 %vm54_vm1, %v45_v7 }
  0x2a   :  { %251 = vmatprep.subr.mxu0 %v306_v0 }
  0x2d   :  { %252 = vmatpush3.xpose.msk.msra.mxu0 %vm54_vm1, %v44_v8 }
  0x2e   :  { %253 = vmatprep.subr.mxu0 %v306_v0 }
  0x31   :  { %254 = vmatpush3.xpose.msk.msra.mxu0 %vm54_vm1, %v43_v9 }
  0x32   :  { %255 = vmatprep.subr.mxu0 %v306_v0 }
  0x35   :  { %256 = vmatpush3.xpose.msk.msra.mxu0 %vm54_vm1, %v42_v10 }
  0x36   :  { %257 = vmatprep.subr.mxu0 %v306_v0 }
  0x39   :  { %258 = vmatpush3.xpose.msk.msra.mxu0 %vm54_vm1, %v41_v11 }
  0x3a   :  { %259 = vmatprep.subr.mxu0 %v306_v0 }
  0x3d   :  { %260 = vmatpush3.xpose.msk.msra.mxu0 %vm54_vm1, %v40_v12 }
  0x3e   :  { %261 = vmatprep.subr.mxu0 %v306_v0 }
  0x41   :  { %262 = vmatpush3.xpose.msk.msra.mxu0 %vm54_vm1, %v39_v13 }
  0x42   :  { %263 = vmatprep.subr.mxu0 %v306_v0 }
  0x45   :  { %264 = vmatpush3.xpose.msk.msra.mxu0 %vm54_vm1, %v38_v14 }
  0x46   :  { %265 = vmatprep.subr.mxu0 %v306_v0 }
  0x49   :  { %266 = vmatpush3.xpose.msk.msra.mxu0 %vm54_vm1, %v37_v15 }
  0x4a   :  { %267 = vmatprep.subr.mxu0 %v306_v0 }
  0x4d   :  { %268 = vmatpush3.xpose.msk.msra.mxu0 %vm54_vm1, %v36_v16 }
  0x50   :  { %270 = vmatmul.mubr.msk.f32.vlgmr.msra.gmra.mxu0 %vm54_vm1, %v52_v17 }
 0x110   :  { %v172_v19 = vpop.f32.mrf.mxu0 }
 0x111   :  { %v176_v20 = vadd.f32 %v172_v19, %v53_v18 }
 0x112   :  { %v271_v21 = vpop.f32.mrf.mxu0 }
 0x113   :  { %177 = vst [vmem:[#allocation2] sm:$0x1] %v176_v20 }
 0x11a   :  { %v181_v23 = vld [vmem:[#allocation2] sm:$0x1] }
 0x11b   :  { %v184_v24 = vadd.f32 %v183_v22, %v181_v23 }
 0x11d   :  { %185 = vst [vmem:[%s368_s3] sm:$0x1] %v184_v24  ;;  %v219_v25 = vmul.f32 -1.442695, %v184_v24 }
 0x11f   :  { %277 = vpow2.f32 %v219_v25 }
 0x12c   :  { %v278_v26 = vpop.eup %277 }
 0x12d   :  { %v189_v27 = vadd.f32 1.0, %v278_v26 }
 0x12f   :  { %279 = vrcp.f32 %v189_v27 }
 0x13c   :  { %v280_v28 = vpop.eup %279 }
 0x13d   :  { %192 = vst [vmem:[%s369_s4] sm:$0x1] %v280_v28 }
 0x13e   :  { %201 = vsyncpa [#allocation5], 1 }

</bundles_post_ra>
